<compile_context>
chip_gen: v6e
topology: v6e:2x2x1
jax: 0.10.0
libtpu: 0.0.40
codegen_flags: <defaults>
</compile_context>

<pallas_src>
import functools

import jax
import jax.numpy as jnp
from jax.experimental import pallas as pl
from jax.experimental.pallas import tpu as pltpu

LANES = 128          # TPU lane width (f32)
ROW_ALIGN = 16       # slab row alignment (also covers bf16 sublane pairing)
MAX_SET_TILE = 256   # max sets per grid step (perf review: 128-512)


def _round_up(n, m):
    return ((n + m - 1) // m) * m


def _as2d(a):
    a = jnp.asarray(a, jnp.float32)
    return a if a.ndim == 2 else a.reshape(1, -1)


def _pad_block(a, rows):
    """Zero-pad a 2-D matrix to [rows, 128] so it can be stacked into the slab."""
    a = _as2d(a)
    assert a.shape[0] <= rows and a.shape[1] <= LANES, a.shape
    return jnp.pad(a, ((0, rows - a.shape[0]), (0, LANES - a.shape[1])))


def _pack_params(params, n_set):
    """Fold + pack all weights into one lane-dense f32 [rows, 128] slab.

    Runs ONCE at build time.  Layout (row offsets are ROW_ALIGN-aligned):
      w12 = [W1a | W2a]          [d_in, 2*d_hidden]   fused eq-layer #1
      ba  = b1a + b2a            [1, d_hidden]        merged layer-1 bias
      wf  = W1b + N*W2b          [d_hidden, d_hidden] eq-layer #2 + pool fold
      bf  = N*(b1b + b2b)        [1, d_hidden]
      wo  = Wo                   [d_hidden, d_out]
      bo  = bo                   [1, d_out]
    """
    w1a, w2a = _as2d(params["w1a"]), _as2d(params["w2a"])
    w1b, w2b = _as2d(params["w1b"]), _as2d(params["w2b"])
    wo = _as2d(params["wo"])
    d_in, d_hidden = w1a.shape
    d_out = wo.shape[1]

    # Fail loudly instead of silently miscompiling the slab offsets.
    assert 2 * d_hidden <= LANES, (
        f"d_hidden={d_hidden} > {LANES // 2}: fused [W1a|W2a] block needs 2*d_hidden <= 128")
    assert d_out <= LANES, f"d_out={d_out} > {LANES} not supported"

    n = jnp.float32(n_set)
    w12 = jnp.concatenate([w1a, w2a], axis=1)                 # [d_in, 2*d_hidden]
    b_a = _as2d(params["b1a"]) + _as2d(params["b2a"])         # [1, d_hidden]
    w_f = w1b + n * w2b                                       # [d_hidden, d_hidden]
    b_f = n * (_as2d(params["b1b"]) + _as2d(params["b2b"]))   # [1, d_hidden]
    b_o = _as2d(params["bo"])                                 # [1, d_out]

    r_in, r_hid = _round_up(d_in, ROW_ALIGN), _round_up(d_hidden, ROW_ALIGN)
    off_w12 = 0
    off_ba = off_w12 + r_in
    off_wf = off_ba + ROW_ALIGN
    off_bf = off_wf + r_hid
    off_wo = off_bf + ROW_ALIGN
    off_bo = off_wo + r_hid

    slab = jnp.concatenate([
        _pad_block(w12, r_in),
        _pad_block(b_a, ROW_ALIGN),
        _pad_block(w_f, r_hid),
        _pad_block(b_f, ROW_ALIGN),
        _pad_block(wo, r_hid),
        _pad_block(b_o, ROW_ALIGN),
    ], axis=0)                                                # [128, 128] at default sizes
    offs = (off_w12, off_ba, off_wf, off_bf, off_wo, off_bo)
    return slab, offs, (d_in, d_hidden, d_out)


def _batch_tiling(batch):
    """Return (sets per grid step, padded batch).

    Large tiles amortize the ~0.35 us/step fixed pipeline overhead; an even
    step count keeps v7x's two TensorCores balanced when the grid is sharded
    via dimension_semantics=("parallel",).
    """
    bp = _round_up(batch, ROW_ALIGN)
    if bp <= MAX_SET_TILE:
        return bp, bp                                   # single grid step
    steps = -(-bp // MAX_SET_TILE)
    if steps % 2:
        steps += 1                                      # even #steps -> balanced across 2 TCs
    tb = _round_up(-(-bp // steps), ROW_ALIGN)
    return tb, steps * tb


def _linear_eq_net_kernel(x_ref, w_ref, out_ref, *, n, d_in, d_hidden, d_out, offs):
    off_w12, off_ba, off_wf, off_bf, off_wo, off_bo = offs
    tb = x_ref.shape[0] // n                                  # sets in this grid step
    f32 = jnp.float32

    # Static slices into the single f32 weight slab.  Its block index never
    # changes, so it stays resident in VMEM across the whole grid.
    w12 = w_ref[off_w12:off_w12 + d_in, 0:2 * d_hidden]      # [d_in, 2*dh]  = [W1a | W2a]
    ba = w_ref[off_ba:off_ba + 1, 0:d_hidden]                 # [1, dh]       = b1a + b2a
    wf = w_ref[off_wf:off_wf + d_hidden, 0:d_hidden]          # [dh, dh]      = W1b + N*W2b
    bf = w_ref[off_bf:off_bf + 1, 0:d_hidden]                 # [1, dh]       = N*(b1b + b2b)
    wo = w_ref[off_wo:off_wo + d_hidden, 0:d_out]             # [dh, d_out]
    bo = w_ref[off_bo:off_bo + 1, 0:d_out]                    # [1, d_out]

    x = x_ref[...]                                            # [tb*n, d_in], f32 or bf16

    # ---- eq layer #1: ONE fused MXU push for both branches --------------------
    #   y[:, :dh] = x @ W1a   (per-element branch)
    #   y[:, dh:] = x @ W2a   (sum branch, still per element; summed below)
    # For bf16 x we cast the tiny resident weight block down so the MXU runs
    # bf16 x bf16; accumulation stays f32 via preferred_element_type.
    y = jnp.dot(x, w12.astype(x.dtype), preferred_element_type=f32)   # [tb*n, 2*dh] f32
    y = y.reshape(tb, n, 2 * d_hidden)        # free when n is a multiple of 8 (sublane-aligned)
    s_y = jnp.sum(y, axis=1)                  # per-set sums of both halves  [tb, 2*dh]  (XLU)
    v = s_y[:, d_hidden:]                     # (sum_n x) @ W2a; realign = one small XLU lane rotate
    h1 = y[:, :, :d_hidden] + v[:, None, :] + ba              # broadcast adds, all f32
    r = jnp.maximum(h1, 0.0)                                  # ReLU between the eq layers

    # ---- eq layer #2 + set pooling, folded into one small f32 matvec ----------
    s = jnp.sum(r, axis=1)                                    # [tb, dh]
    pooled = jnp.dot(s, wf, preferred_element_type=f32) + bf
    pooled = jnp.maximum(pooled, 0.0)                         # post_pool ReLU

    # ---- final Linear; output block is only d_out lanes wide (no zero padding)
    out_ref[...] = jnp.dot(pooled, wo, preferred_element_type=f32) + bo


def make_linear_eq_net(params, n_set, input_dtype=jnp.bfloat16):
    """Build a jitted forward for a fixed set size N.

    Weight folding + slab packing runs once here (not per call).  The returned
    callable accepts x of shape [N, d_in] (original torch signature) or
    [B, N, d_in] for B independent sets.  `input_dtype` controls the streamed
    x dtype (bf16 default halves the dominant HBM read; accumulation and all
    post-matmul math stay f32).
    """
    slab, offs, (d_in, d_hidden, d_out) = _pack_params(params, n_set)
    kernel = functools.partial(_linear_eq_net_kernel, n=n_set, d_in=d_in,
                               d_hidden=d_hidden, d_out=d_out, offs=offs)

    def _forward(x):
        if x.ndim == 2:                      # single set, original torch signature
            return _forward(x[None])[0]
        assert x.ndim == 3 and x.shape[1] == n_set and x.shape[2] == d_in, x.shape
        batch = x.shape[0]
        tb, bp = _batch_tiling(batch)

        # At scale, feed bf16 x directly so this cast is a no-op / fuses upstream.
        xf = x.astype(input_dtype).reshape(batch * n_set, d_in)
        if bp != batch:
            # Padded sets are all-zero; they yield garbage rows (relu(bias)
            # driven) which are sliced off below -- never sum over the batch dim.
            xf = jnp.pad(xf, ((0, (bp - batch) * n_set), (0, 0)))

        out = pl.pallas_call(
            kernel,
            out_shape=jax.ShapeDtypeStruct((bp, d_out), jnp.float32),
            grid=(bp // tb,),
            in_specs=[
                pl.BlockSpec((tb * n_set, d_in), lambda i: (i, 0)),   # batch tile of sets
                pl.BlockSpec(slab.shape, lambda i: (0, 0)),           # resident weight slab
            ],
            out_specs=pl.BlockSpec((tb, d_out), lambda i: (i, 0)),    # d_out-wide, no lane padding
            compiler_params=pltpu.CompilerParams(
                # Batch tiles are independent: v7x shards them across its 2 TCs.
                dimension_semantics=("parallel",),
            ),
        )(xf, slab)
        return out[:batch]

    return jax.jit(_forward)


# ---------------------------------------------------------------------------
# Deterministic parameter construction (mimics nn.Linear init: U(-k, k) with
# k = 1/sqrt(fan_in)).  Weights stored transposed as [in, out]; biases [1, out].
# ---------------------------------------------------------------------------
def init_params(key, d_in=10, d_hidden=32, d_out=4):
    def linear(key, fan_in, fan_out):
        k = 1.0 / jnp.sqrt(jnp.float32(fan_in))
        kw, kb = jax.random.split(key)
        w = jax.random.uniform(kw, (fan_in, fan_out), jnp.float32, -k, k)
        b = jax.random.uniform(kb, (1, fan_out), jnp.float32, -k, k)
        return w, b

    keys = jax.random.split(key, 5)
    w1a, b1a = linear(keys[0], d_in, d_hidden)
    w2a, b2a = linear(keys[1], d_in, d_hidden)
    w1b, b1b = linear(keys[2], d_hidden, d_hidden)
    w2b, b2b = linear(keys[3], d_hidden, d_hidden)
    wo, bo = linear(keys[4], d_hidden, d_out)
    return dict(w1a=w1a, b1a=b1a, w2a=w2a, b2a=b2a,
                w1b=w1b, b1b=b1b, w2b=w2b, b2b=b2b,
                wo=wo, bo=bo)


# Pure-JAX reference of the torch forward (unfolded math) for one set.
def reference_forward(x, p):
    mm = functools.partial(jnp.matmul, precision=jax.lax.Precision.HIGHEST)

    def eq(h, w1, b1, w2, b2):
        return (mm(h, w1) + b1) + (mm(jnp.sum(h, axis=0, keepdims=True), w2) + b2)

    h = eq(x, p["w1a"], p["b1a"], p["w2a"], p["b2a"])
    h = jnp.maximum(h, 0.0)
    h = eq(h, p["w1b"], p["b1b"], p["w2b"], p["b2b"])
    pool = jnp.maximum(jnp.sum(h, axis=0), 0.0)
    return mm(pool, p["wo"]) + p["bo"][0]


if __name__ == "__main__":
    d_in, d_hidden, d_out = 10, 32, 4
    n_set = 8

    key = jax.random.PRNGKey(0)
    k_p, k_x, k_x2 = jax.random.split(key, 3)
    params = init_params(k_p, d_in, d_hidden, d_out)

    # ---- small batch, f32 input path: tight check against the reference -------
    batch = 16
    x = jax.random.normal(k_x, (batch, n_set, d_in), jnp.float32)
    ref = jax.vmap(lambda xb: reference_forward(xb, params))(x)

    fwd_f32 = make_linear_eq_net(params, n_set, input_dtype=jnp.float32)
    out = jax.block_until_ready(fwd_f32(x))
    assert out.shape == (batch, d_out), out.shape
    assert jnp.allclose(out, ref, atol=1e-3, rtol=1e-3), float(jnp.max(jnp.abs(out - ref)))

    # Single-set path (original torch signature: x is [N, d_in]).
    out1 = jax.block_until_ready(fwd_f32(x[0]))
    assert out1.shape == (d_out,), out1.shape
    assert jnp.allclose(out1, ref[0], atol=1e-3, rtol=1e-3), (out1, ref[0])

    # ---- larger batch, bf16 input path: exercises the multi-step grid (even
    # step count), batch-tile padding and the bf16 MXU path. --------------------
    batch2 = 600
    x2 = jax.random.normal(k_x2, (batch2, n_set, d_in), jnp.float32)
    ref2 = jax.vmap(lambda xb: reference_forward(xb, params))(x2)

    fwd_bf16 = make_linear_eq_net(params, n_set, input_dtype=jnp.bfloat16)
    out2 = jax.block_until_ready(fwd_bf16(x2))
    assert out2.shape == (batch2, d_out), out2.shape
    assert jnp.allclose(out2, ref2, atol=0.25, rtol=0.03), float(jnp.max(jnp.abs(out2 - ref2)))

    print("KERNEL_OK")
</pallas_src>

<mosaic_0001>
module attributes {stable_mosaic.version = 11 : i64} {
  func.func @_linear_eq_net_kernel(%arg0: i32, %arg1: memref<128x10xf32, #tpu.memory_space<vmem>>, %arg2: memref<128x128xf32, #tpu.memory_space<vmem>>, %arg3: memref<16x4xf32, #tpu.memory_space<vmem>>) attributes {dimension_semantics = [#tpu.dimension_semantics<parallel>], iteration_bounds = array<i64: 1>, scalar_prefetch = 0 : i64, scratch_operands = 0 : i64, tpu.core_type = #tpu.core_type<tc>, window_params = [{transform_indices = @transform_0, window_bounds = array<i64: 128, 10>}, {pipeline_mode = #tpu.pipeline_mode<synchronous>, transform_indices = @transform_1, window_bounds = array<i64: 128, 128>}, {transform_indices = @transform_2, window_bounds = array<i64: 16, 4>}]} {
    %c0 = arith.constant 0 : index
    %c0_0 = arith.constant 0 : index
    %0 = vector.load %arg2[%c0, %c0_0] : memref<128x128xf32, #tpu.memory_space<vmem>>, vector<10x64xf32>
    %c16 = arith.constant 16 : index
    %c0_1 = arith.constant 0 : index
    %1 = vector.load %arg2[%c16, %c0_1] : memref<128x128xf32, #tpu.memory_space<vmem>>, vector<1x32xf32>
    %c32 = arith.constant 32 : index
    %c0_2 = arith.constant 0 : index
    %2 = vector.load %arg2[%c32, %c0_2] : memref<128x128xf32, #tpu.memory_space<vmem>>, vector<32x32xf32>
    %c64 = arith.constant 64 : index
    %c0_3 = arith.constant 0 : index
    %3 = vector.load %arg2[%c64, %c0_3] : memref<128x128xf32, #tpu.memory_space<vmem>>, vector<1x32xf32>
    %c80 = arith.constant 80 : index
    %c0_4 = arith.constant 0 : index
    %4 = vector.load %arg2[%c80, %c0_4] : memref<128x128xf32, #tpu.memory_space<vmem>>, vector<32x4xf32>
    %c112 = arith.constant 112 : index
    %c0_5 = arith.constant 0 : index
    %5 = vector.load %arg2[%c112, %c0_5] : memref<128x128xf32, #tpu.memory_space<vmem>>, vector<1x4xf32>
    %c0_6 = arith.constant 0 : index
    %c0_7 = arith.constant 0 : index
    %6 = vector.load %arg1[%c0_6, %c0_7] : memref<128x10xf32, #tpu.memory_space<vmem>>, vector<128x10xf32>
    %cst = arith.constant dense<0.000000e+00> : vector<128x64xf32>
    %7 = tpu.matmul %6, %0, %cst {dimension_numbers = #tpu.dot_dimension_numbers<[1], [0], [0], [1], [0, 0, 1, 1], [], []>} : vector<128x10xf32>, vector<10x64xf32>, vector<128x64xf32> -> vector<128x64xf32>
    %8 = vector.shape_cast %7 : vector<128x64xf32> to vector<16x8x64xf32>
    %cst_8 = arith.constant dense<0.000000e+00> : vector<16x64xf32>
    %9 = vector.multi_reduction <add>, %8, %cst_8 [1] : vector<16x8x64xf32> to vector<16x64xf32>
    %10 = vector.extract_strided_slice %9 {offsets = [0, 32], sizes = [16, 32], strides = [1, 1]} : vector<16x64xf32> to vector<16x32xf32>
    %11 = vector.extract_strided_slice %8 {offsets = [0, 0, 0], sizes = [16, 8, 32], strides = [1, 1, 1]} : vector<16x8x64xf32> to vector<16x8x32xf32>
    %12 = vector.shape_cast %10 : vector<16x32xf32> to vector<16x1x32xf32>
    %13 = vector.broadcast %12 : vector<16x1x32xf32> to vector<16x8x32xf32>
    %14 = arith.addf %11, %13 : vector<16x8x32xf32>
    %15 = vector.shape_cast %1 : vector<1x32xf32> to vector<1x1x32xf32>
    %16 = vector.broadcast %15 : vector<1x1x32xf32> to vector<16x8x32xf32>
    %17 = arith.addf %14, %16 : vector<16x8x32xf32>
    %cst_9 = arith.constant 0.000000e+00 : f32
    %18 = vector.broadcast %cst_9 : f32 to vector<16x8x32xf32>
    %19 = arith.maximumf %17, %18 : vector<16x8x32xf32>
    %cst_10 = arith.constant dense<0.000000e+00> : vector<16x32xf32>
    %20 = vector.multi_reduction <add>, %19, %cst_10 [1] : vector<16x8x32xf32> to vector<16x32xf32>
    %cst_11 = arith.constant dense<0.000000e+00> : vector<16x32xf32>
    %21 = tpu.matmul %20, %2, %cst_11 {dimension_numbers = #tpu.dot_dimension_numbers<[1], [0], [0], [1], [0, 0, 1, 1], [], []>} : vector<16x32xf32>, vector<32x32xf32>, vector<16x32xf32> -> vector<16x32xf32>
    %22 = vector.broadcast %3 : vector<1x32xf32> to vector<16x32xf32>
    %23 = arith.addf %21, %22 : vector<16x32xf32>
    %cst_12 = arith.constant 0.000000e+00 : f32
    %24 = vector.broadcast %cst_12 : f32 to vector<16x32xf32>
    %25 = arith.maximumf %23, %24 : vector<16x32xf32>
    %cst_13 = arith.constant dense<0.000000e+00> : vector<16x4xf32>
    %26 = tpu.matmul %25, %4, %cst_13 {dimension_numbers = #tpu.dot_dimension_numbers<[1], [0], [0], [1], [0, 0, 1, 1], [], []>} : vector<16x32xf32>, vector<32x4xf32>, vector<16x4xf32> -> vector<16x4xf32>
    %27 = vector.broadcast %5 : vector<1x4xf32> to vector<16x4xf32>
    %28 = arith.addf %26, %27 : vector<16x4xf32>
    %c0_14 = arith.constant 0 : index
    %c0_15 = arith.constant 0 : index
    %29 = vector.load %arg3[%c0_14, %c0_15] : memref<16x4xf32, #tpu.memory_space<vmem>>, vector<16x4xf32>
    tpu.vector_store %arg3[%c0_14, %c0_15], %28 {strides = array<i32>} : memref<16x4xf32, #tpu.memory_space<vmem>>, vector<16x4xf32>,
    return
  }
  func.func @transform_0(%arg0: i32) -> (i32, i32) {
    %c0_i32 = arith.constant 0 : i32
    %c0_i32_0 = arith.constant 0 : i32
    return %arg0, %c0_i32 : i32, i32
  }
  func.func @transform_1(%arg0: i32) -> (i32, i32) {
    %c0_i32 = arith.constant 0 : i32
    %c0_i32_0 = arith.constant 0 : i32
    %c0_i32_1 = arith.constant 0 : i32
    return %c0_i32, %c0_i32_0 : i32, i32
  }
  func.func @transform_2(%arg0: i32) -> (i32, i32) {
    %c0_i32 = arith.constant 0 : i32
    %c0_i32_0 = arith.constant 0 : i32
    return %arg0, %c0_i32 : i32, i32
  }
}

</mosaic_0001>

<bundles_post_ra>
// kernel: _forward.1
= control target key start
LH: loop header
LB: loop body
LE: loop exit
PB: predicated region body
PF: predicated region fallthrough
CT: control target
= control target key end

     0   :  { %vm89_vm0 = vcmask 1041408   ;;  %vm40_vm1 = vcmask 80896   ;;  %vm238_vm2 = vcmask 523264   ;;  %vm467_vm3 = vcmask 261120   ;;  %s1189_s1 = inlined_call_operand.vmem [shape: f32[128,128], index: 1, kind: input, shape index: {}]   ;;  %s1190_s0 = inlined_call_operand.vmem [shape: f32[128,10], index: 0, kind: input, shape index: {}]   ;;  %s1191_s2 = inlined_call_operand.vmem [shape: f32[16,4], index: 2, kind: output, shape index: {}]  }
   0x1   :  { %v12_v0 = vld [vmem:[%s1189_s1 + $0x8] sm:$0x3]  ;;  %v11_v1 = vld [vmem:[%s1189_s1] sm:$0xff]  ;;  %v26_v6 = vld [vmem:[%s1190_s0 + $0x10] sm:$0xff]  ;;  %vm600_vm4 = vcmask 1041409   ;;  %vm602_vm5 = vcmask 1042434  }
   0x2   :  { %848 = vmatprep.subr.msk.mxu0 %vm89_vm0, %v12_v0  ;;  %898 = vmatprep.subr.msk.mxu1 %vm89_vm0, %v12_v0  ;;  %v24_v2 = vld [vmem:[%s1190_s0] sm:$0xff]  ;;  %v25_v4 = vld [vmem:[%s1190_s0 + $0x8] sm:$0xff]  ;;  %v38_v7 = vld [vmem:[%s1190_s0 + $0x70] sm:$0xff]  ;;  %vm604_vm6 = vcmask 1043459   ;;  %vm606_vm7 = vcmask 1044484   ;;  %vm608_vm8 = vcmask 1045509  }
   0x3   :  { %849 = vmatpush3.msk.msra.mxu0 %vm89_vm0, %v12_v0  ;;  %900 = vmatpush3.msk.msra.mxu1 %vm89_vm0, %v12_v0  ;;  %v36_v3 = vld [vmem:[%s1190_s0 + $0x60] sm:$0xff]  ;;  %v37_v5 = vld [vmem:[%s1190_s0 + $0x68] sm:$0xff]  ;;  %v27_v8 = vld [vmem:[%s1190_s0 + $0x18] sm:$0xff]  ;;  %vm610_vm9 = vcmask 1046534   ;;  %vm612_vm10 = vcmask 1047559   ;;  %vm787_vm11 = vcmask 31744  }
   0x4   :  { %850 = vmatprep.subr.mxu0 %v11_v1  ;;  %899 = vmatprep.subr.mxu1 %v11_v1  ;;  %v39_v9 = vld [vmem:[%s1190_s0 + $0x78] sm:$0xff]  ;;  %v28_v10 = vld [vmem:[%s1190_s0 + $0x20] sm:$0xff]  ;;  %v29_v11 = vld [vmem:[%s1190_s0 + $0x28] sm:$0xff] }
   0x5   :  { %851 = vmatpush3.msra.mxu0 %v11_v1  ;;  %901 = vmatpush3.msra.mxu1 %v11_v1  ;;  %v30_v12 = vld [vmem:[%s1190_s0 + $0x30] sm:$0xff]  ;;  %v31_v13 = vld [vmem:[%s1190_s0 + $0x38] sm:$0xff]  ;;  %v32_v14 = vld [vmem:[%s1190_s0 + $0x40] sm:$0xff] }
   0x6   :  { %852 = vmatprep.mubr.msk.f32.mxu0 %vm40_vm1, %v24_v2  ;;  %870 = vmatprep.mubr.msk.f32.mxu1 %vm40_vm1, %v36_v3  ;;  %v33_v15 = vld [vmem:[%s1190_s0 + $0x48] sm:$0xff]  ;;  %v34_v16 = vld [vmem:[%s1190_s0 + $0x50] sm:$0xff]  ;;  %v35_v17 = vld [vmem:[%s1190_s0 + $0x58] sm:$0xff]  ;;  %s903_s0 = smov 96  }
   0x7   :  { %853 = vmatmul.mubr.msk.f32.vlgmr.msra.gmra.mxu0 %vm40_vm1, %v25_v4  ;;  %871 = vmatmul.mubr.msk.f32.vlgmr.msra.gmra.mxu1 %vm40_vm1, %v37_v5 }
   0x8   :  { %855 = vmatprep.mubr.msk.f32.mxu0 %vm40_vm1, %v26_v6  ;;  %873 = vmatprep.mubr.msk.f32.mxu1 %vm40_vm1, %v38_v7 }
   0xb   :  { %856 = vmatmul.mubr.msk.f32.gmra.mxu0 %vm40_vm1, %v27_v8  ;;  %874 = vmatmul.mubr.msk.f32.gmra.mxu1 %vm40_vm1, %v39_v9 }
   0xc   :  { %858 = vmatprep.mubr.msk.f32.mxu0 %vm40_vm1, %v28_v10 }
   0xf   :  { %859 = vmatmul.mubr.msk.f32.gmra.mxu0 %vm40_vm1, %v29_v11 }
  0x10   :  { %861 = vmatprep.mubr.msk.f32.mxu0 %vm40_vm1, %v30_v12 }
  0x13   :  { %862 = vmatmul.mubr.msk.f32.gmra.mxu0 %vm40_vm1, %v31_v13 }
  0x14   :  { %864 = vmatprep.mubr.msk.f32.mxu0 %vm40_vm1, %v32_v14 }
  0x17   :  { %865 = vmatmul.mubr.msk.f32.gmra.mxu0 %vm40_vm1, %v33_v15 }
  0x18   :  { %867 = vmatprep.mubr.msk.f32.mxu0 %vm40_vm1, %v34_v16 }
  0x1b   :  { %868 = vmatmul.mubr.msk.f32.gmra.mxu0 %vm40_vm1, %v35_v17 }
  0xc7   :  { %v989_v18 = vpop.f32.mrf.mxu0  ;;  %v991_v19 = vpop.f32.mrf.mxu1 }
  0xc8   :  { %v246_v20 = vsel %vm238_vm2, %v989_v18, 0.0  ;;  %v330_v21 = vsel %vm238_vm2, %v991_v19, 0.0 }
  0xc9   :  { %v247_v22 = vrot.slane %v246_v20, 4  ;;  %v331_v23 = vrot.slane %v330_v21, 4  ;;  %v997_v24 = vpop.f32.mrf.mxu0  ;;  %v999_v25 = vpop.f32.mrf.mxu1 }
  0xca   :  { %v239_v26 = vsel %vm238_vm2, %v997_v24, 0.0  ;;  %v323_v27 = vsel %vm238_vm2, %v999_v25, 0.0 }
  0xcb   :  { %v248_v28 = vadd.f32 %v247_v22, %v246_v20  ;;  %v332_v29 = vadd.f32 %v331_v23, %v330_v21  ;;  %v240_v30 = vrot.slane %v239_v26, 4  ;;  %v324_v31 = vrot.slane %v323_v27, 4  ;;  %v1005_v32 = vpop.f32.mrf.mxu0  ;;  %v1013_v41 = vpop.f32.mrf.mxu1 }
  0xcc   :  { %v260_v33 = vsel %vm238_vm2, %v1005_v32, 0.0 }
  0xcd   :  { %v249_v34 = vrot.slane %v248_v28, 2  ;;  %v333_v35 = vrot.slane %v332_v29, 2  ;;  %v241_v36 = vadd.f32 %v240_v30, %v239_v26  ;;  %v325_v37 = vadd.f32 %v324_v31, %v323_v27  ;;  %v1009_v38 = vpop.f32.mrf.mxu0  ;;  %v1023_v57 = vpop.f32.mrf.mxu1 }
  0xce   :  { %v261_v39 = vrot.slane %v260_v33, 4  ;;  %v253_v40 = vsel %vm238_vm2, %v1009_v38, 0.0  ;;  %v337_v5 = vsel %vm238_vm2, %v1023_v57, 0.0  ;;  %v344_v26 = vsel %vm238_vm2, %v1013_v41, 0.0 }
  0xcf   :  { %v334_v42 = vadd.f32 %v333_v35, %v332_v29  ;;  %v242_v43 = vrot.slane %v241_v36, 2  ;;  %v254_v44 = vrot.slane %v253_v40, 4  ;;  %v1015_v45 = vpop.f32.mrf.mxu0  ;;  %v250_v48 = vadd.f32 %v249_v34, %v248_v28 }
  0xd0   :  { %v262_v46 = vadd.f32 %v261_v39, %v260_v33  ;;  %v274_v47 = vsel %vm238_vm2, %v1015_v45, 0.0  ;;  %v326_v49 = vrot.slane %v325_v37, 2  ;;  %v338_v30 = vrot.slane %v337_v5, 4 }
  0xd1   :  { %v255_v50 = vadd.f32 %v254_v44, %v253_v40  ;;  %v275_v51 = vrot.slane %v274_v47, 4  ;;  %v1019_v52 = vpop.f32.mrf.mxu0  ;;  %v243_v53 = vadd.f32 %v242_v43, %v241_v36  ;;  %v251_v56 = vrot.slane %v250_v48, 1 }
  0xd2   :  { %v263_v54 = vrot.slane %v262_v46, 2  ;;  %v267_v55 = vsel %vm238_vm2, %v1019_v52, 0.0  ;;  %v335_v62 = vrot.slane %v334_v42, 1  ;;  %v327_v6 = vadd.f32 %v326_v49, %v325_v37 }
  0xd3   :  { %v256_v58 = vrot.slane %v255_v50, 2  ;;  %v276_v59 = vadd.f32 %v275_v51, %v274_v47  ;;  %v268_v60 = vrot.slane %v267_v55, 4  ;;  %v1025_v61 = vpop.f32.mrf.mxu0  ;;  %v252_v63 = vadd.f32 %v251_v56, %v250_v48 }
  0xd4   :  { %v264_v0 = vadd.f32 %v263_v54, %v262_v46  ;;  %v244_v9 = vrot.slane %v243_v53, 1  ;;  %v288_v11 = vsel %vm238_vm2, %v1025_v61, 0.0  ;;  %v336_v14 = vadd.f32 %v335_v62, %v334_v42 }
  0xd5   :  { %v257_v1 = vadd.f32 %v256_v58, %v255_v50  ;;  %v277_v2 = vrot.slane %v276_v59, 2  ;;  %v269_v3 = vadd.f32 %v268_v60, %v267_v55  ;;  %v1027_v4 = vpop.f32.mrf.mxu0  ;;  %369 = vrot.lane.b32.xlu0 %v252_v63, %s903_s0  ;;  %v289_v27 = vrot.slane %v288_v11, 4 }
  0xd6   :  { %v281_v7 = vsel %vm238_vm2, %v1027_v4, 0.0  ;;  %v265_v8 = vrot.slane %v264_v0, 1  ;;  %v245_v29 = vadd.f32 %v244_v9, %v243_v53  ;;  %v328_v36 = vrot.slane %v327_v6, 1 }
  0xd7   :  { %v270_v10 = vrot.slane %v269_v3, 2  ;;  %v282_v12 = vrot.slane %v281_v7, 4  ;;  %v1036_v13 = vpop.f32.mrf.mxu0  ;;  %v278_v15 = vadd.f32 %v277_v2, %v276_v59  ;;  %v258_v20 = vrot.slane %v257_v1, 1 }
  0xd8   :  { %v302_v16 = vsel %vm238_vm2, %v1036_v13, 0.0  ;;  %v266_v17 = vadd.f32 %v265_v8, %v264_v0  ;;  %v290_v48 = vadd.f32 %v289_v27, %v288_v11  ;;  %v345_v49 = vrot.slane %v344_v26, 4 }
  0xd9   :  { %v283_v21 = vadd.f32 %v282_v12, %v281_v7  ;;  %v303_v22 = vrot.slane %v302_v16, 4  ;;  %v1040_v23 = vpop.f32.mrf.mxu0  ;;  %393 = vrot.lane.b32.xlu0 %v336_v14, %s903_s0  ;;  %v271_v31 = vadd.f32 %v270_v10, %v269_v3  ;;  %v259_v40 = vadd.f32 %v258_v20, %v257_v1 }
  0xda   :  { %373 = vrot.lane.b32.xlu1 %v266_v17, %s903_s0  ;;  %v295_v28 = vsel %vm238_vm2, %v1040_v23, 0.0  ;;  %v279_v42 = vrot.slane %v278_v15, 1  ;;  %v339_v51 = vadd.f32 %v338_v30, %v337_v5  ;;  %v329_v56 = vadd.f32 %v328_v36, %v327_v6 }
  0xdb   :  { %v304_v33 = vadd.f32 %v303_v22, %v302_v16  ;;  %v296_v34 = vrot.slane %v295_v28, 4  ;;  %v1048_v35 = vpop.f32.mrf.mxu0  ;;  %v284_v37 = vrot.slane %v283_v21, 2  ;;  %v272_v62 = vrot.slane %v271_v31, 1 }
  0xdc   :  { %v316_v39 = vsel %vm238_vm2, %v1048_v35, 0.0  ;;  %v280_v60 = vadd.f32 %v279_v42, %v278_v15  ;;  %v346_v2 = vadd.f32 %v345_v49, %v344_v26  ;;  %v291_v3 = vrot.slane %v290_v48, 2  ;;  %v15_v42 = vld [vmem:[%s1189_s1 + $0x28] sm:$0xff] }
  0xdd   :  { %v305_v43 = vrot.slane %v304_v33, 2  ;;  %v297_v44 = vadd.f32 %v296_v34, %v295_v28  ;;  %v317_v46 = vrot.slane %v316_v39, 4  ;;  %v1052_v47 = vpop.f32.mrf.mxu0  ;;  %367 = vrot.lane.b32.xlu0 %v245_v29, %s903_s0  ;;  %v285_v58 = vadd.f32 %v284_v37, %v283_v21 }
  0xde   :  { %371 = vrot.lane.b32.xlu1 %v259_v40, %s903_s0  ;;  %v309_v50 = vsel %vm238_vm2, %v1052_v47, 0.0  ;;  %v340_v10 = vrot.slane %v339_v51, 2  ;;  %v273_v11 = vadd.f32 %v272_v62, %v271_v31  ;;  %v292_v15 = vadd.f32 %v291_v3, %v290_v48  ;;  %v16_v40 = vld [vmem:[%s1189_s1 + $0x30] sm:$0xff] }
  0xdf   :  { %v306_v53 = vadd.f32 %v305_v43, %v304_v33  ;;  %v318_v54 = vadd.f32 %v317_v46, %v316_v39  ;;  %v310_v55 = vrot.slane %v309_v50, 4  ;;  %v298_v59 = vrot.slane %v297_v44, 2  ;;  %v17_v39 = vld [vmem:[%s1189_s1 + $0x38] sm:$0xff]  ;;  %v14_v43 = vld [vmem:[%s1189_s1 + $0x20] sm:$0xff] }
  0xe0   :  { %v286_v6 = vrot.slane %v285_v58, 1  ;;  %v347_v16 = vrot.slane %v346_v2, 2  ;;  %v341_v21 = vadd.f32 %v340_v10, %v339_v51  ;;  %v293_v30 = vrot.slane %v292_v15, 1  ;;  %876 = vmatprep.subr.mxu1 %v17_v39 }
  0xe1   :  { %v319_v63 = vrot.slane %v318_v54, 2  ;;  %v311_v0 = vadd.f32 %v310_v55, %v309_v50  ;;  %v307_v1 = vrot.slane %v306_v53, 1  ;;  %391 = vrot.lane.b32.xlu0 %v329_v56, %s903_s0  ;;  %v299_v9 = vadd.f32 %v298_v59, %v297_v44  ;;  %877 = vmatpush3.msra.mxu1 %v17_v39  ;;  %v1084_v44 = vld [vmem:[%s1189_s1 + $0x10] ss:$0 sm:$0xff] }
  0xe2   :  { %377 = vrot.lane.b32.xlu1 %v280_v60, %s903_s0  ;;  %v287_v22 = vadd.f32 %v286_v6, %v285_v58  ;;  %v348_v27 = vadd.f32 %v347_v16, %v346_v2  ;;  %v342_v31 = vrot.slane %v341_v21, 1  ;;  %v294_v33 = vadd.f32 %v293_v30, %v292_v15  ;;  %878 = vmatprep.subr.mxu1 %v16_v40 }
  0xe3   :  { %v320_v7 = vadd.f32 %v319_v63, %v318_v54  ;;  %v312_v8 = vrot.slane %v311_v0, 2  ;;  %v308_v5 = vadd.f32 %v307_v1, %v306_v53  ;;  %v300_v26 = vrot.slane %v299_v9, 1  ;;  %879 = vmatpush3.msra.mxu1 %v16_v40 }
  0xe4   :  { %v343_v34 = vadd.f32 %v342_v31, %v341_v21  ;;  %v349_v36 = vrot.slane %v348_v27, 1  ;;  %880 = vmatprep.subr.mxu1 %v15_v42 }
  0xe5   :  { %v313_v12 = vadd.f32 %v312_v8, %v311_v0  ;;  %v321_v14 = vrot.slane %v320_v7, 1  ;;  %385 = vrot.lane.b32.xlu0 %v308_v5, %s903_s0  ;;  %v301_v28 = vadd.f32 %v300_v26, %v299_v9  ;;  %881 = vmatpush3.msra.mxu1 %v15_v42 }
  0xe6   :  { %375 = vrot.lane.b32.xlu1 %v273_v11, %s903_s0  ;;  %v350_v37 = vadd.f32 %v349_v36, %v348_v27  ;;  %882 = vmatprep.subr.mxu1 %v14_v43 }
  0xe7   :  { %v322_v17 = vadd.f32 %v321_v14, %v320_v7  ;;  %v314_v20 = vrot.slane %v313_v12, 1  ;;  %883 = vmatpush3.msra.mxu1 %v14_v43 }
  0xe9   :  { %389 = vrot.lane.b32.xlu0 %v322_v17, %s903_s0  ;;  %v315_v29 = vadd.f32 %v314_v20, %v313_v12 }
  0xea   :  { %379 = vrot.lane.b32.xlu1 %v287_v22, %s903_s0 }
  0xed   :  { %387 = vrot.lane.b32.xlu0 %v315_v29, %s903_s0 }
  0xee   :  { %383 = vrot.lane.b32.xlu1 %v301_v28, %s903_s0 }
  0xf1   :  { %395 = vrot.lane.b32.xlu0 %v343_v34, %s903_s0 }
  0xf2   :  { %381 = vrot.lane.b32.xlu1 %v294_v33, %s903_s0 }
  0xf6   :  { %397 = vrot.lane.b32.xlu1 %v350_v37, %s903_s0 }
 0x147   :  { %v370_v46 = vpop.permute.xlu0 %369 }
 0x148   :  { %v416_v48 = vadd.f32 %v989_v18, %v370_v46 }
 0x14a   :  { %v436_v49 = vadd.f32 %v1084_v44, %v416_v48 }
 0x14b   :  { %v394_v50 = vpop.permute.xlu0 %393 }
 0x14c   :  { %v374_v51 = vpop.permute.xlu1 %373  ;;  %v452_v53 = vmax.f32 %v436_v49, 0.0  ;;  %v428_v54 = vadd.f32 %v991_v19, %v394_v50 }
 0x14d   :  { %v418_v55 = vadd.f32 %v1005_v32, %v374_v51 }
 0x14e   :  { %v475_v56 = vsel %vm467_vm3, %v452_v53, 0.0  ;;  %v448_v58 = vadd.f32 %v1084_v44, %v428_v54 }
 0x14f   :  { %v438_v59 = vadd.f32 %v1084_v44, %v418_v55  ;;  %v476_v60 = vrot.slane %v475_v56, 4  ;;  %v368_v62 = vpop.permute.xlu0 %367 }
 0x150   :  { %v372_v63 = vpop.permute.xlu1 %371  ;;  %v464_v18 = vmax.f32 %v448_v58, 0.0  ;;  %v415_v1 = vadd.f32 %v368_v62, %v997_v24 }
 0x151   :  { %v454_v0 = vmax.f32 %v438_v59, 0.0  ;;  %v417_v2 = vadd.f32 %v372_v63, %v1009_v38  ;;  %v477_v3 = vadd.f32 %v476_v60, %v475_v56 }
 0x152   :  { %v559_v19 = vsel %vm467_vm3, %v464_v18, 0.0  ;;  %v435_v7 = vadd.f32 %v1084_v44, %v415_v1 }
 0x153   :  { %v489_v32 = vsel %vm467_vm3, %v454_v0, 0.0  ;;  %v437_v8 = vadd.f32 %v1084_v44, %v417_v2  ;;  %v560_v5 = vrot.slane %v559_v19, 4  ;;  %v392_v10 = vpop.permute.xlu0 %391  ;;  %v478_v38 = vrot.slane %v477_v3, 2 }
 0x154   :  { %v490_v9 = vrot.slane %v489_v32, 4  ;;  %v378_v11 = vpop.permute.xlu1 %377  ;;  %v451_v6 = vmax.f32 %v435_v7, 0.0  ;;  %v427_v14 = vadd.f32 %v392_v10, %v999_v25 }
 0x155   :  { %v453_v12 = vmax.f32 %v437_v8, 0.0  ;;  %v420_v24 = vadd.f32 %v1015_v45, %v378_v11  ;;  %v561_v22 = vadd.f32 %v560_v5, %v559_v19  ;;  %v479_v33 = vadd.f32 %v478_v38, %v477_v3 }
 0x156   :  { %v491_v15 = vadd.f32 %v490_v9, %v489_v32  ;;  %v468_v16 = vsel %vm467_vm3, %v451_v6, 0.0  ;;  %v447_v20 = vadd.f32 %v1084_v44, %v427_v14 }
 0x157   :  { %v482_v17 = vsel %vm467_vm3, %v453_v12, 0.0  ;;  %v440_v21 = vadd.f32 %v1084_v44, %v420_v24  ;;  %v469_v27 = vrot.slane %v468_v16, 4  ;;  %v386_v29 = vpop.permute.xlu0 %385  ;;  %v562_v42 = vrot.slane %v561_v22, 2 }
 0x158   :  { %v492_v26 = vrot.slane %v491_v15, 2  ;;  %v376_v28 = vpop.permute.xlu1 %375  ;;  %v483_v30 = vrot.slane %v482_v17, 4  ;;  %v463_v31 = vmax.f32 %v447_v20, 0.0  ;;  %v480_v62 = vrot.slane %v479_v33, 1 }
 0x159   :  { %v456_v25 = vmax.f32 %v440_v21, 0.0  ;;  %v419_v45 = vadd.f32 %v376_v28, %v1019_v52  ;;  %v470_v34 = vadd.f32 %v469_v27, %v468_v16  ;;  %v424_v52 = vadd.f32 %v1036_v13, %v386_v29 }
 0x15a   :  { %v484_v36 = vadd.f32 %v483_v30, %v482_v17  ;;  %v552_v37 = vsel %vm467_vm3, %v463_v31, 0.0  ;;  %v493_v43 = vadd.f32 %v492_v26, %v491_v15  ;;  %v1113_v3 = vadd.f32 %v562_v42, %v561_v22 }
 0x15b   :  { %v503_v39 = vsel %vm467_vm3, %v456_v25, 0.0  ;;  %v439_v40 = vadd.f32 %v1084_v44, %v419_v45  ;;  %v471_v46 = vrot.slane %v470_v34, 2  ;;  %v553_v48 = vrot.slane %v552_v37, 4  ;;  %v390_v50 = vpop.permute.xlu0 %389 }
 0x15c   :  { %v380_v49 = vpop.permute.xlu1 %379  ;;  %v485_v51 = vrot.slane %v484_v36, 2  ;;  %v504_v53 = vrot.slane %v503_v39, 4  ;;  %v444_v60 = vadd.f32 %v1084_v44, %v424_v52  ;;  %v494_v19 = vrot.slane %v493_v43, 1 }
 0x15d   :  { %v455_v54 = vmax.f32 %v439_v40, 0.0  ;;  %v472_v55 = vadd.f32 %v471_v46, %v470_v34  ;;  %v554_v56 = vadd.f32 %v553_v48, %v552_v37  ;;  %v421_v0 = vadd.f32 %v380_v49, %v1027_v4 }
 0x15e   :  { %v486_v58 = vadd.f32 %v485_v51, %v484_v36  ;;  %v505_v63 = vadd.f32 %v504_v53, %v503_v39  ;;  %v460_v32 = vmax.f32 %v444_v60, 0.0  ;;  %v426_v13 = vadd.f32 %v1048_v35, %v390_v50 }
 0x15f   :  { %v496_v59 = vsel %vm467_vm3, %v455_v54, 0.0  ;;  %v388_v2 = vpop.permute.xlu0 %387  ;;  %v473_v7 = vrot.slane %v472_v55, 1  ;;  %v555_v8 = vrot.slane %v554_v56, 2  ;;  %v441_v9 = vadd.f32 %v1084_v44, %v421_v0 }
 0x160   :  { %v497_v18 = vrot.slane %v496_v59, 4  ;;  %v384_v1 = vpop.permute.xlu1 %383  ;;  %v487_v10 = vrot.slane %v486_v58, 1  ;;  %v531_v11 = vsel %vm467_vm3, %v460_v32, 0.0  ;;  %v446_v6 = vadd.f32 %v1084_v44, %v426_v13 }
 0x161   :  { %v481_v12 = vadd.f32 %v480_v62, %v479_v33  ;;  %v506_v4 = vrot.slane %v505_v63, 2  ;;  %v532_v14 = vrot.slane %v531_v11, 4  ;;  %v564_v38 = vrot.slane %v1113_v3, 1 }
 0x162   :  { %v498_v5 = vadd.f32 %v497_v18, %v496_v59  ;;  %v1120_v15 = vadd.f32 %v494_v19, %v493_v43  ;;  %v457_v35 = vmax.f32 %v441_v9, 0.0  ;;  %v462_v16 = vmax.f32 %v446_v6, 0.0 }
 0x163   :  { %v474_v17 = vadd.f32 %v473_v7, %v472_v55  ;;  %v1122_v20 = vadd.f32 %v555_v8, %v554_v56  ;;  %v423_v22 = vadd.f32 %v384_v1, %v1040_v23  ;;  %v396_v26 = vpop.permute.xlu0 %395  ;;  %v488_v27 = vadd.f32 %v487_v10, %v486_v58 }
 0x164   :  { %v382_v24 = vpop.permute.xlu1 %381  ;;  %v499_v21 = vrot.slane %v498_v5, 2  ;;  %v510_v28 = vsel %vm467_vm3, %v457_v35, 0.0  ;;  %v545_v29 = vsel %vm467_vm3, %v462_v16, 0.0  ;;  %v425_v30 = vadd.f32 %v388_v2, %v1052_v47 }
 0x165   :  { %v507_v31 = vadd.f32 %v506_v4, %v505_v63  ;;  %v533_v25 = vadd.f32 %v532_v14, %v531_v11  ;;  %v511_v45 = vrot.slane %v510_v28, 4  ;;  %v546_v33 = vrot.slane %v545_v29, 4 }
 0x166   :  { %v443_v34 = vadd.f32 %v1084_v44, %v423_v22  ;;  %v445_v36 = vadd.f32 %v1084_v44, %v425_v30  ;;  %v422_v37 = vadd.f32 %v1025_v61, %v382_v24  ;;  %v429_v23 = vadd.f32 %v396_v26, %v1023_v57 }
 0x167   :  { %v601_v40 = vsel %vm600_vm4, %v481_v12, %v474_v17  ;;  %v500_v42 = vadd.f32 %v499_v21, %v498_v5  ;;  %v512_v43 = vadd.f32 %v511_v45, %v510_v28  ;;  %v547_v46 = vadd.f32 %v546_v33, %v545_v29 }
 0x168   :  { %v398_v39 = vpop.permute.xlu1 %397  ;;  %v459_v48 = vmax.f32 %v443_v34, 0.0  ;;  %v461_v47 = vmax.f32 %v445_v36, 0.0  ;;  %v442_v49 = vadd.f32 %v1084_v44, %v422_v37  ;;  %v449_v50 = vadd.f32 %v1084_v44, %v429_v23 }
 0x169   :  { %v534_v51 = vrot.slane %v533_v25, 2  ;;  %v513_v53 = vrot.slane %v512_v43, 2  ;;  %v548_v54 = vrot.slane %v547_v46, 2  ;;  %v430_v61 = vadd.f32 %v1013_v41, %v398_v39 }
 0x16a   :  { %v524_v57 = vsel %vm467_vm3, %v459_v48, 0.0  ;;  %v538_v52 = vsel %vm467_vm3, %v461_v47, 0.0  ;;  %v458_v55 = vmax.f32 %v442_v49, 0.0  ;;  %v465_v56 = vmax.f32 %v449_v50, 0.0 }
 0x16b   :  { %v557_v58 = vrot.slane %v1122_v20, 1  ;;  %v501_v59 = vrot.slane %v500_v42, 1  ;;  %v514_v60 = vadd.f32 %v513_v53, %v512_v43  ;;  %v525_v62 = vrot.slane %v524_v57, 4 }
 0x16c   :  { %v539_v63 = vrot.slane %v538_v52, 4  ;;  %v517_v18 = vsel %vm467_vm3, %v458_v55, 0.0  ;;  %v566_v0 = vsel %vm467_vm3, %v465_v56, 0.0  ;;  %v450_v1 = vadd.f32 %v1084_v44, %v430_v61 }
 0x16d   :  { %v508_v41 = vrot.slane %v507_v31, 1  ;;  %v535_v2 = vadd.f32 %v534_v51, %v533_v25  ;;  %v526_v19 = vadd.f32 %v525_v62, %v524_v57  ;;  %v518_v32 = vrot.slane %v517_v18, 4  ;;  %v19_v62 = vld [vmem:[%s1189_s1 + $0x50] sm:$0xff] }
 0x16e   :  { %v549_v13 = vadd.f32 %v548_v54, %v547_v46  ;;  %v540_v7 = vadd.f32 %v539_v63, %v538_v52  ;;  %v567_v8 = vrot.slane %v566_v0, 4  ;;  %v466_v5 = vmax.f32 %v450_v1, 0.0  ;;  %v812_v63 = vld [vmem:[%s1189_s1 + $0x40] ss:$0 sm:$0xff] }
 0x16f   :  { %v603_v9 = vsel %vm602_vm5, %v488_v27, %v601_v40  ;;  %v502_v10 = vadd.f32 %v501_v59, %v500_v42  ;;  %v527_v11 = vrot.slane %v526_v19, 2  ;;  %v519_v6 = vadd.f32 %v518_v32, %v517_v18  ;;  %v815_v32 = vld [vmem:[%s1189_s1 + $0x70] ss:$0 sm:$0xff] }
 0x170   :  { %v515_v12 = vrot.slane %v514_v60, 1  ;;  %v541_v4 = vrot.slane %v540_v7, 2  ;;  %v568_v14 = vadd.f32 %v567_v8, %v566_v0  ;;  %v573_v44 = vsel %vm467_vm3, %v466_v5, 0.0 }
 0x171   :  { %v536_v24 = vrot.slane %v535_v2, 1  ;;  %v528_v35 = vadd.f32 %v527_v11, %v526_v19  ;;  %v520_v16 = vrot.slane %v519_v6, 2  ;;  %v574_v17 = vrot.slane %v573_v44, 4 }
 0x172   :  { %v509_v21 = vadd.f32 %v508_v41, %v507_v31  ;;  %v550_v22 = vrot.slane %v549_v13, 1  ;;  %v542_v26 = vadd.f32 %v541_v4, %v540_v7  ;;  %v569_v28 = vrot.slane %v568_v14, 2 }
 0x173   :  { %v529_v29 = vrot.slane %v528_v35, 1  ;;  %v521_v30 = vadd.f32 %v520_v16, %v519_v6  ;;  %v575_v25 = vadd.f32 %v574_v17, %v573_v44  ;;  %v605_v27 = vsel %vm604_vm6, %v1120_v15, %v603_v9 }
 0x174   :  { %v516_v45 = vadd.f32 %v515_v12, %v514_v60  ;;  %v543_v33 = vrot.slane %v542_v26, 1  ;;  %v570_v34 = vadd.f32 %v569_v28, %v568_v14  ;;  %v607_v36 = vsel %vm606_vm7, %v502_v10, %v605_v27  ;;  %v20_v60 = vld [vmem:[%s1189_s1 + $0x58] sm:$0xff] }
 0x175   :  { %v537_v37 = vadd.f32 %v536_v24, %v535_v2  ;;  %v530_v23 = vadd.f32 %v529_v29, %v528_v35  ;;  %v576_v39 = vrot.slane %v575_v25, 2  ;;  %v522_v40 = vrot.slane %v521_v30, 1 }
 0x176   :  { %v551_v42 = vadd.f32 %v550_v22, %v549_v13  ;;  %v544_v31 = vadd.f32 %v543_v33, %v542_v26  ;;  %v571_v43 = vrot.slane %v570_v34, 1  ;;  %v609_v49 = vsel %vm608_vm8, %v509_v21, %v607_v36 }
 0x177   :  { %v614_v46 = vsel %vm600_vm4, %v537_v37, %v530_v23  ;;  %v577_v48 = vadd.f32 %v576_v39, %v575_v25  ;;  %v523_v47 = vadd.f32 %v522_v40, %v521_v30  ;;  %v558_v15 = vadd.f32 %v557_v58, %v1122_v20 }
 0x178   :  { %v615_v50 = vsel %vm602_vm5, %v544_v31, %v614_v46  ;;  %v572_v51 = vadd.f32 %v571_v43, %v570_v34  ;;  %v611_v53 = vsel %vm610_vm9, %v516_v45, %v609_v49  ;;  %v565_v54 = vadd.f32 %v564_v38, %v1113_v3  ;;  %v22_v3 = vld [vmem:[%s1189_s1 + $0x68] sm:$0xff]  ;;  %v21_v38 = vld [vmem:[%s1189_s1 + $0x60] sm:$0xff] }
 0x179   :  { %v578_v61 = vrot.slane %v577_v48, 1  ;;  %v613_v57 = vsel %vm612_vm10, %v523_v47, %v611_v53  ;;  %v616_v52 = vsel %vm604_vm6, %v551_v42, %v615_v50  ;;  %887 = vmatprep.subr.mxu1 %v22_v3 }
 0x17a   :  { %v617_v55 = vsel %vm606_vm7, %v558_v15, %v616_v52  ;;  %884 = vmatprep.mubr.msk.f32.mxu1 %vm467_vm3, %v613_v57 }
 0x17b   :  { %v579_v56 = vadd.f32 %v578_v61, %v577_v48  ;;  %v618_v20 = vsel %vm608_vm8, %v565_v54, %v617_v55 }
 0x17c   :  { %v619_v58 = vsel %vm610_vm9, %v572_v51, %v618_v20 }
 0x17d   :  { %v620_v59 = vsel %vm612_vm10, %v579_v56, %v619_v58 }
 0x17e   :  { %885 = vmatmul.mubr.msk.f32.vlgmr.msra.gmra.mxu1 %vm467_vm3, %v620_v59 }
 0x17f   :  { %888 = vmatpush3.msra.mxu1 %v22_v3 }
 0x180   :  { %889 = vmatprep.subr.mxu1 %v21_v38 }
 0x181   :  { %890 = vmatpush3.msra.mxu1 %v21_v38 }
 0x182   :  { %891 = vmatprep.subr.mxu1 %v20_v60 }
 0x183   :  { %892 = vmatpush3.msra.mxu1 %v20_v60 }
 0x184   :  { %893 = vmatprep.subr.mxu1 %v19_v62 }
 0x185   :  { %894 = vmatpush3.msra.mxu1 %v19_v62 }
 0x23e   :  { %v886_v18 = vpop.f32.mrf.mxu1 }
 0x23f   :  { %v697_v0 = vadd.f32 %v886_v18, %v812_v63 }
 0x240   :  { %v691_v1 = vpop.f32.mrf.mxu1 }
 0x241   :  { %v692_v41 = vadd.f32 %v812_v63, %v691_v1  ;;  %v701_v19 = vmax.f32 %v697_v0, 0.0 }
 0x243   :  { %v700_v2 = vmax.f32 %v692_v41, 0.0 }
 0x245   :  { %895 = vmatprep.mubr.msk.f32.mxu1 %vm467_vm3, %v700_v2 }
 0x246   :  { %896 = vmatmul.mubr.msk.f32.vlgmr.msra.gmra.mxu1 %vm467_vm3, %v701_v19 }
 0x306   :  { %v897_v13 = vpop.f32.mrf.mxu1 }
 0x307   :  { %v784_v7 = vadd.f32 %v897_v13, %v815_v32 }
 0x308   :  { %v778_v8 = vpop.f32.mrf.mxu1 }
 0x309   :  { %789 = vst.msk [vmem:[%s1191_s2 + $0x8] sm:$0xff] %vm787_vm11, %v784_v7  ;;  %v779_v5 = vadd.f32 %v815_v32, %v778_v8 }
 0x30b   :  { %788 = vst.msk [vmem:[%s1191_s2] sm:$0xff] %vm787_vm11, %v779_v5 }

</bundles_post_ra>
